<compile_context>
chip_gen: v7x
topology: tpu7x:2x2x1
jax: 0.10.0
libtpu: 0.0.40
codegen_flags: <defaults>
</compile_context>

<pallas_src>
import jax
import jax.numpy as jnp
import numpy as np
from jax import lax
from jax.experimental import pallas as pl
from jax.experimental.pallas import tpu as pltpu

OUT_HW = 7                      # AdaptiveAvgPool2d target
NOUT = OUT_HW * OUT_HW          # 49
_SUBLANE = 8
_LANE = 128
_NOUT_PAD = ((NOUT + _SUBLANE - 1) // _SUBLANE) * _SUBLANE   # 56 (VMEM sizing only)


def _round_up(x: int, m: int) -> int:
    return ((x + m - 1) // m) * m


def _adaptive_pool_matrix(in_size: int, out_size: int) -> np.ndarray:
    """Row-averaging matrix (out_size, in_size) matching torch AdaptiveAvgPool."""
    P = np.zeros((out_size, in_size), dtype=np.float32)
    for i in range(out_size):
        start = (i * in_size) // out_size
        end = -((-(i + 1) * in_size) // out_size)  # ceil((i+1)*in/out)
        P[i, start:end] = 1.0 / (end - start)
    return P


def _choose_k_tiling(hw: int, cap: int = 4096):
    """Return (k_blk, hw_pad): k_blk is a multiple of 128 dividing hw_pad >= hw."""
    hw128 = _round_up(hw, _LANE)
    if hw128 <= cap:
        return hw128, hw128                       # single K block, minimal pad
    best = _LANE
    for d in range(cap, _LANE - 1, -_LANE):       # largest 128-multiple divisor
        if hw128 % d == 0:
            best = d
            break
    if best >= 512:
        return best, hw128                        # big aligned steps, no extra pad
    # only tiny aligned divisors exist -> pad K so steps stay big and aligned
    k_blk = 2048
    return k_blk, _round_up(hw, k_blk)


def _choose_c_tiling(c: int):
    """Return (c_blk, c_pad): c_pad a multiple of 128, c_blk divides c_pad."""
    c_pad = _round_up(c, _LANE)
    c_blk = _LANE
    for cand in (512, 384, 256, 128):
        if c_pad % cand == 0:
            c_blk = cand
            break
    # keep the "parallel" channel axis >= 2 blocks when C allows it (v7x: 2 TCs)
    if c_pad // c_blk == 1 and c_pad > _LANE:
        best = _LANE
        for d in range(_LANE, c_pad, _LANE):
            if c_pad % d == 0:
                best = d
        c_blk = best
    return c_blk, c_pad


def _partial_product(p_ref, x_ref):
    """(49, k_blk) x (c_blk, k_blk)^T on the MXU, f32 accumulate."""
    k = pl.program_id(1)
    # Resident P holds all K slabs on its leading axis; the streamed fallback
    # presents exactly one slab (leading dim 1).
    idx = k if p_ref.shape[0] > 1 else 0
    return lax.dot_general(
        p_ref[idx], x_ref[...],
        dimension_numbers=(((1,), (1,)), ((), ())),
        preferred_element_type=jnp.float32)


def _pool_kernel_inplace(p_ref, x_ref, o_ref):
    """f32 output: accumulate straight into the VMEM-resident output block."""
    partial = _partial_product(p_ref, x_ref)
    k = pl.program_id(1)

    @pl.when(k == 0)
    def _():
        o_ref[...] = partial

    @pl.when(k != 0)
    def _():
        o_ref[...] += partial


def _pool_kernel_scratch(p_ref, x_ref, o_ref, acc_ref):
    """sub-f32 output: f32 scratch accumulator + single finalize cast."""
    partial = _partial_product(p_ref, x_ref)
    k = pl.program_id(1)

    @pl.when(k == 0)
    def _():
        acc_ref[...] = partial

    @pl.when(k != 0)
    def _():
        acc_ref[...] += partial

    @pl.when(k == pl.num_programs(1) - 1)
    def _():
        o_ref[...] = acc_ref[...].astype(o_ref.dtype)


@jax.jit
def data_processor(x):
    """x: (1, C, H, W) -> (49, C), matching the PyTorch forward (batch == 1)."""
    assert x.ndim == 4 and x.shape[0] == 1, "module semantics require batch == 1"
    _, C, H, W = x.shape
    HW = H * W

    c_blk, c_pad = _choose_c_tiling(C)
    k_blk, hw_pad = _choose_k_tiling(HW)
    num_c = c_pad // c_blk
    num_k = hw_pad // k_blk

    out_dtype = x.dtype
    op_dtype = jnp.float32 if x.dtype == jnp.float32 else x.dtype
    op_item = jnp.dtype(op_dtype).itemsize
    out_item = jnp.dtype(out_dtype).itemsize

    # Host-side constant: kron pooling matrix, zero-padded along K (zero columns
    # make spatial padding numerically exact) and pre-sliced into K slabs so the
    # kernel indexes slabs along the leading axis (no dynamic lane slicing).
    ph = _adaptive_pool_matrix(H, OUT_HW)                   # (7, H)
    pw = _adaptive_pool_matrix(W, OUT_HW)                   # (7, W)
    pmat = np.zeros((NOUT, hw_pad), dtype=np.float32)
    pmat[:, :HW] = np.kron(ph, pw)                          # row o = i*7 + j
    p_blocks = jnp.asarray(
        pmat.reshape(NOUT, num_k, k_blk).transpose(1, 0, 2), dtype=op_dtype)

    # squeeze + flatten spatial dims (contiguous), zero-pad to tile multiples.
    x_flat = x.reshape(C, HW)
    x_flat = jnp.pad(x_flat, ((0, c_pad - C), (0, hw_pad - HW)))

    # P placement: fully VMEM-resident (constant block index => DMA'd once)
    # unless too large, in which case stream one K slab per grid step.
    p_resident_bytes = 2 * num_k * _NOUT_PAD * k_blk * op_item   # pessimistic 2x
    if p_resident_bytes <= (24 << 20):
        p_spec = pl.BlockSpec((num_k, NOUT, k_blk), lambda c, k: (0, 0, 0))
        p_buf_bytes = p_resident_bytes
    else:
        p_spec = pl.BlockSpec((1, NOUT, k_blk), lambda c, k: (k, 0, 0))
        p_buf_bytes = 2 * _NOUT_PAD * k_blk * op_item

    use_scratch = out_dtype != jnp.float32
    kernel = _pool_kernel_scratch if use_scratch else _pool_kernel_inplace
    scratch_shapes = ([pltpu.VMEM((NOUT, c_blk), jnp.float32)]
                      if use_scratch else [])

    # VMEM budget from the actual double-buffered footprint, capped at 64 MiB so
    # the identical tiling is legal on v7x (64 MiB/TC) as well as 128 MiB parts.
    x_buf_bytes = 2 * c_blk * k_blk * op_item
    o_buf_bytes = 2 * _NOUT_PAD * c_blk * out_item
    a_buf_bytes = _NOUT_PAD * c_blk * 4 if use_scratch else 0
    need = p_buf_bytes + x_buf_bytes + o_buf_bytes + a_buf_bytes
    vmem_limit = int(min(max(need * 14 // 10 + (4 << 20), 32 << 20), 64 << 20))

    cost = pl.CostEstimate(
        flops=2 * NOUT * c_pad * hw_pad,
        transcendentals=0,
        bytes_accessed=op_item * (c_pad * hw_pad + NOUT * hw_pad)
        + out_item * NOUT * c_pad)

    out = pl.pallas_call(
        kernel,
        out_shape=jax.ShapeDtypeStruct((NOUT, c_pad), out_dtype),
        grid_spec=pltpu.PrefetchScalarGridSpec(
            num_scalar_prefetch=0,
            grid=(num_c, num_k),
            in_specs=[
                p_spec,                                              # pooling weights
                pl.BlockSpec((c_blk, k_blk), lambda c, k: (c, k)),   # x block
            ],
            out_specs=pl.BlockSpec((NOUT, c_blk), lambda c, k: (0, c)),
            scratch_shapes=scratch_shapes,
        ),
        compiler_params=pltpu.CompilerParams(
            dimension_semantics=("parallel", "arbitrary"),
            vmem_limit_bytes=vmem_limit),
        cost_estimate=cost,
    )(p_blocks, x_flat)

    return out[:, :C]   # drop channel padding; already in PyTorch (49, C) layout


def _reference(x):
    """Pure-JAX reference of the PyTorch forward (for verification)."""
    _, C, H, W = x.shape
    ph = jnp.asarray(_adaptive_pool_matrix(H, OUT_HW))
    pw = jnp.asarray(_adaptive_pool_matrix(W, OUT_HW))
    pooled = jnp.einsum('chw,oh,pw->cop', x[0].astype(jnp.float32), ph, pw)
    return jnp.transpose(pooled, (1, 2, 0)).reshape(-1, C).astype(x.dtype)


if __name__ == "__main__":
    key = jax.random.PRNGKey(0)
    # batch must be 1 for the module's squeeze/permute/view to be well-defined
    x = jax.random.normal(key, (1, 4, 16, 16), dtype=jnp.float32)

    out = jax.block_until_ready(data_processor(x))
    ref = _reference(x)

    assert out.shape == (49, 4), out.shape
    assert jnp.allclose(out, ref, atol=1e-5, rtol=1e-5), "mismatch vs reference"

    print("KERNEL_OK")
</pallas_src>

<mosaic_0001>
module attributes {stable_mosaic.version = 11 : i64} {
  func.func @_pool_kernel_inplace(%arg0: i32, %arg1: i32, %arg2: memref<1x49x256xf32, #tpu.memory_space<vmem>>, %arg3: memref<128x256xf32, #tpu.memory_space<vmem>>, %arg4: memref<49x128xf32, #tpu.memory_space<vmem>>) attributes {dimension_semantics = [#tpu.dimension_semantics<parallel>, #tpu.dimension_semantics<arbitrary>], iteration_bounds = array<i64: 1, 1>, scalar_prefetch = 0 : i64, scratch_operands = 0 : i64, tpu.core_type = #tpu.core_type<tc>, window_params = [{pipeline_mode = #tpu.pipeline_mode<synchronous>, transform_indices = @transform_0, window_bounds = array<i64: 1, 49, 256>}, {transform_indices = @transform_1, window_bounds = array<i64: 128, 256>}, {transform_indices = @transform_2, window_bounds = array<i64: 49, 128>}]} {
    %c0 = arith.constant 0 : index
    %c0_0 = arith.constant 0 : index
    %c0_1 = arith.constant 0 : index
    %0 = vector.load %arg2[%c0, %c0_0, %c0_1] : memref<1x49x256xf32, #tpu.memory_space<vmem>>, vector<1x49x256xf32>
    %1 = vector.shape_cast %0 : vector<1x49x256xf32> to vector<49x256xf32>
    %c0_2 = arith.constant 0 : index
    %c0_3 = arith.constant 0 : index
    %2 = vector.load %arg3[%c0_2, %c0_3] : memref<128x256xf32, #tpu.memory_space<vmem>>, vector<128x256xf32>
    %cst = arith.constant dense<0.000000e+00> : vector<49x128xf32>
    %3 = tpu.matmul %1, %2, %cst {dimension_numbers = #tpu.dot_dimension_numbers<[1], [1], [0], [0], [0, 0, 1, 0], [], []>} : vector<49x256xf32>, vector<128x256xf32>, vector<49x128xf32> -> vector<49x128xf32>
    %c0_i32 = arith.constant 0 : i32
    %4 = arith.cmpi eq, %arg1, %c0_i32 : i32
    %5 = arith.extui %4 : i1 to i32
    %c0_i32_4 = arith.constant 0 : i32
    %6 = arith.cmpi ne, %5, %c0_i32_4 : i32
    scf.if %6 {
      %c0_7 = arith.constant 0 : index
      %c0_8 = arith.constant 0 : index
      %10 = vector.load %arg4[%c0_7, %c0_8] : memref<49x128xf32, #tpu.memory_space<vmem>>, vector<49x128xf32>
      tpu.vector_store %arg4[%c0_7, %c0_8], %3 {strides = array<i32>} : memref<49x128xf32, #tpu.memory_space<vmem>>, vector<49x128xf32>,
    } else {
    }
    %c0_i32_5 = arith.constant 0 : i32
    %7 = arith.cmpi ne, %arg1, %c0_i32_5 : i32
    %8 = arith.extui %7 : i1 to i32
    %c0_i32_6 = arith.constant 0 : i32
    %9 = arith.cmpi ne, %8, %c0_i32_6 : i32
    scf.if %9 {
      %c0_7 = arith.constant 0 : index
      %c0_8 = arith.constant 0 : index
      %10 = vector.load %arg4[%c0_7, %c0_8] : memref<49x128xf32, #tpu.memory_space<vmem>>, vector<49x128xf32>
      %11 = arith.addf %10, %3 : vector<49x128xf32>
      %c0_9 = arith.constant 0 : index
      %c0_10 = arith.constant 0 : index
      %12 = vector.load %arg4[%c0_9, %c0_10] : memref<49x128xf32, #tpu.memory_space<vmem>>, vector<49x128xf32>
      tpu.vector_store %arg4[%c0_9, %c0_10], %11 {strides = array<i32>} : memref<49x128xf32, #tpu.memory_space<vmem>>, vector<49x128xf32>,
    } else {
    }
    return
  }
  func.func @transform_0(%arg0: i32, %arg1: i32) -> (i32, i32, i32) {
    %c0_i32 = arith.constant 0 : i32
    %c0_i32_0 = arith.constant 0 : i32
    %c0_i32_1 = arith.constant 0 : i32
    %c0_i32_2 = arith.constant 0 : i32
    return %c0_i32, %c0_i32_0, %c0_i32_1 : i32, i32, i32
  }
  func.func @transform_1(%arg0: i32, %arg1: i32) -> (i32, i32) {
    %c0_i32 = arith.constant 0 : i32
    return %arg0, %arg1 : i32, i32
  }
  func.func @transform_2(%arg0: i32, %arg1: i32) -> (i32, i32) {
    %c0_i32 = arith.constant 0 : i32
    %c0_i32_0 = arith.constant 0 : i32
    return %c0_i32, %arg0 : i32, i32
  }
}

</mosaic_0001>

<bundles_post_ra>
// kernel: data_processor.1
= control target key start
LH: loop header
LB: loop body
LE: loop exit
PB: predicated region body
PF: predicated region fallthrough
CT: control target
= control target key end

     0   :  { %s419_s1 = inlined_call_operand.vmem [shape: f32[128,256], index: 1, kind: input, shape index: {}]   ;;  %s420_s0 = inlined_call_operand.vmem [shape: f32[1,49,256], index: 0, kind: input, shape index: {}]   ;;  %s421_s2 = inlined_call_operand.vmem [shape: f32[49,128], index: 2, kind: output, shape index: {}]  }
   0x1   :  { %v26_v0 = vld [vmem:[%s419_s1 + $0x8] sm:$0xff]  ;;  %v28_v1 = vld [vmem:[%s419_s1 + $0x18] sm:$0xff]  ;;  %v25_v2 = vld [vmem:[%s419_s1] sm:$0xff] }
   0x2   :  { %v197_v3 = vpack.c.bf16 %v28_v1, %v26_v0  ;;  %v27_v4 = vld [vmem:[%s419_s1 + $0x10] sm:$0xff]  ;;  %v30_v5 = vld [vmem:[%s419_s1 + $0x28] sm:$0xff]  ;;  %v32_v6 = vld [vmem:[%s419_s1 + $0x38] sm:$0xff] }
   0x3   :  { %v199_v7 = vpack.c.bf16 %v27_v4, %v25_v2  ;;  %v201_v8 = vpack.c.bf16 %v32_v6, %v30_v5  ;;  %v29_v9 = vld [vmem:[%s419_s1 + $0x20] sm:$0xff]  ;;  %v31_v10 = vld [vmem:[%s419_s1 + $0x30] sm:$0xff]  ;;  %v34_v11 = vld [vmem:[%s419_s1 + $0x48] sm:$0xff] }
   0x4   :  { %198 = vmatprep.subr.bf16.mxu0 %v197_v3  ;;  %229 = vmatprep.subr.bf16.mxu1 %v197_v3  ;;  %v36_v12 = vld [vmem:[%s419_s1 + $0x58] sm:$0xff]  ;;  %v203_v13 = vpack.c.bf16 %v31_v10, %v29_v9  ;;  %v12_v15 = vld [vmem:[%s420_s0 + $0x8] sm:$0xff]  ;;  %v33_v17 = vld [vmem:[%s419_s1 + $0x40] sm:$0xff] }
   0x5   :  { %200 = vmatpush1.bf16.xpose.msra.mxu0 %v199_v7  ;;  %237 = vmatpush1.bf16.xpose.msra.mxu1 %v199_v7  ;;  %v205_v14 = vpack.c.bf16 %v36_v12, %v34_v11  ;;  %v20_v16 = vld [vmem:[%s420_s0 + $0x48] sm:$0xff]  ;;  %v35_v18 = vld [vmem:[%s419_s1 + $0x50] sm:$0xff]  ;;  %v40_v20 = vld [vmem:[%s419_s1 + $0x78] sm:$0xff] }
   0x6   :  { %202 = vmatprep.subr.bf16.mxu0 %v201_v8  ;;  %230 = vmatprep.subr.bf16.mxu1 %v201_v8  ;;  %v38_v19 = vld [vmem:[%s419_s1 + $0x68] sm:$0xff]  ;;  %v207_v21 = vpack.c.bf16 %v35_v18, %v33_v17  ;;  %v37_v23 = vld [vmem:[%s419_s1 + $0x60] sm:$0xff]  ;;  %v39_v24 = vld [vmem:[%s419_s1 + $0x70] sm:$0xff] }
   0x7   :  { %121 = vmatprep.mubr.f32.mxu0 %v12_v15  ;;  %141 = vmatprep.mubr.f32.mxu1 %v20_v16  ;;  %v209_v22 = vpack.c.bf16 %v40_v20, %v38_v19  ;;  %v42_v25 = vld [vmem:[%s419_s1 + $0x88] sm:$0xff]  ;;  %v44_v26 = vld [vmem:[%s419_s1 + $0x98] sm:$0xff]  ;;  %v211_v27 = vpack.c.bf16 %v39_v24, %v37_v23  ;;  %v41_v29 = vld [vmem:[%s419_s1 + $0x80] sm:$0xff] }
   0x8   :  { %v213_v28 = vpack.c.bf16 %v44_v26, %v42_v25  ;;  %v43_v30 = vld [vmem:[%s419_s1 + $0x90] sm:$0xff]  ;;  %v46_v31 = vld [vmem:[%s419_s1 + $0xa8] sm:$0xff]  ;;  %v48_v32 = vld [vmem:[%s419_s1 + $0xb8] sm:$0xff] }
   0x9   :  { %v215_v33 = vpack.c.bf16 %v43_v30, %v41_v29  ;;  %v217_v34 = vpack.c.bf16 %v48_v32, %v46_v31  ;;  %v45_v35 = vld [vmem:[%s419_s1 + $0xa0] sm:$0xff]  ;;  %v47_v36 = vld [vmem:[%s419_s1 + $0xb0] sm:$0xff]  ;;  %v50_v37 = vld [vmem:[%s419_s1 + $0xc8] sm:$0xff] }
   0xa   :  { %v52_v38 = vld [vmem:[%s419_s1 + $0xd8] sm:$0xff]  ;;  %v219_v39 = vpack.c.bf16 %v47_v36, %v45_v35  ;;  %v49_v41 = vld [vmem:[%s419_s1 + $0xc0] sm:$0xff]  ;;  %v51_v42 = vld [vmem:[%s419_s1 + $0xd0] sm:$0xff] }
   0xb   :  { %v221_v40 = vpack.c.bf16 %v52_v38, %v50_v37  ;;  %v54_v43 = vld [vmem:[%s419_s1 + $0xe8] sm:$0xff]  ;;  %v56_v44 = vld [vmem:[%s419_s1 + $0xf8] sm:$0xff]  ;;  %v223_v45 = vpack.c.bf16 %v51_v42, %v49_v41  ;;  %v53_v47 = vld [vmem:[%s419_s1 + $0xe0] sm:$0xff] }
   0xc   :  { %v225_v46 = vpack.c.bf16 %v56_v44, %v54_v43  ;;  %v55_v48 = vld [vmem:[%s419_s1 + $0xf0] sm:$0xff]  ;;  %v11_v50 = vld [vmem:[%s420_s0] sm:$0xff]  ;;  %v14_v52 = vld [vmem:[%s420_s0 + $0x18] sm:$0xff] }
   0xd   :  { %204 = vmatpush1.bf16.xpose.msra.mxu0 %v203_v13  ;;  %238 = vmatpush1.bf16.xpose.msra.mxu1 %v203_v13  ;;  %v227_v49 = vpack.c.bf16 %v55_v48, %v53_v47  ;;  %v19_v51 = vld [vmem:[%s420_s0 + $0x40] sm:$0xff]  ;;  %v22_v53 = vld [vmem:[%s420_s0 + $0x58] sm:$0xff]  ;;  %v13_v54 = vld [vmem:[%s420_s0 + $0x10] sm:$0xff] }
   0xe   :  { %206 = vmatprep.subr.bf16.mxu0 %v205_v14  ;;  %231 = vmatprep.subr.bf16.mxu1 %v205_v14  ;;  %v21_v55 = vld [vmem:[%s420_s0 + $0x50] sm:$0xff]  ;;  %v16_v56 = vld [vmem:[%s420_s0 + $0x28] sm:$0xff]  ;;  %v15_v58 = vld [vmem:[%s420_s0 + $0x20] sm:$0xff] }
   0xf   :  { %v24_v57 = vld [vmem:[%s420_s0 + $0x68] sm:$0x1]  ;;  %v23_v59 = vld [vmem:[%s420_s0 + $0x60] sm:$0x1]  ;;  %v18_v60 = vld [vmem:[%s420_s0 + $0x38] sm:$0xff] }
  0x10   :  { %v17_v61 = vld [vmem:[%s420_s0 + $0x30] sm:$0xff] }
  0x15   :  { %208 = vmatpush1.bf16.xpose.msra.mxu0 %v207_v21  ;;  %239 = vmatpush1.bf16.xpose.msra.mxu1 %v207_v21 }
  0x16   :  { %210 = vmatprep.subr.bf16.mxu0 %v209_v22  ;;  %232 = vmatprep.subr.bf16.mxu1 %v209_v22 }
  0x1d   :  { %212 = vmatpush1.bf16.xpose.msra.mxu0 %v211_v27  ;;  %240 = vmatpush1.bf16.xpose.msra.mxu1 %v211_v27 }
  0x1e   :  { %214 = vmatprep.subr.bf16.mxu0 %v213_v28  ;;  %233 = vmatprep.subr.bf16.mxu1 %v213_v28 }
  0x25   :  { %216 = vmatpush1.bf16.xpose.msra.mxu0 %v215_v33  ;;  %241 = vmatpush1.bf16.xpose.msra.mxu1 %v215_v33 }
  0x26   :  { %218 = vmatprep.subr.bf16.mxu0 %v217_v34  ;;  %234 = vmatprep.subr.bf16.mxu1 %v217_v34 }
  0x2d   :  { %220 = vmatpush1.bf16.xpose.msra.mxu0 %v219_v39  ;;  %242 = vmatpush1.bf16.xpose.msra.mxu1 %v219_v39 }
  0x2e   :  { %222 = vmatprep.subr.bf16.mxu0 %v221_v40  ;;  %235 = vmatprep.subr.bf16.mxu1 %v221_v40 }
  0x35   :  { %224 = vmatpush1.bf16.xpose.msra.mxu0 %v223_v45  ;;  %243 = vmatpush1.bf16.xpose.msra.mxu1 %v223_v45 }
  0x36   :  { %226 = vmatprep.subr.bf16.mxu0 %v225_v46  ;;  %236 = vmatprep.subr.bf16.mxu1 %v225_v46 }
  0x3d   :  { %228 = vmatpush1.bf16.xpose.msra.mxu0 %v227_v49  ;;  %244 = vmatpush1.bf16.xpose.msra.mxu1 %v227_v49 }
  0x44   :  { %122 = vmatmul.mubr.f32.vlgmr.msra.gmra.mrb[0].mxu0 %v11_v50  ;;  %142 = vmatmul.mubr.f32.vlgmr.msra.gmra.mrb[0].mxu1 %v19_v51 }
  0x45   :  { %126 = vmatprep.mubr.f32.mxu0 %v14_v52  ;;  %146 = vmatprep.mubr.f32.mxu1 %v22_v53 }
  0x48   :  { %127 = vmatmul.mubr.f32.gmra.mrb[2].mxu0 %v13_v54  ;;  %147 = vmatmul.mubr.f32.gmra.mrb[2].mxu1 %v21_v55 }
  0x49   :  { %131 = vmatprep.mubr.f32.mxu0 %v16_v56  ;;  %151 = vmatprep.mubr.f32.mxu1 %v24_v57 }
  0x4c   :  { %132 = vmatmul.mubr.f32.gmra.mrb[4].mxu0 %v15_v58  ;;  %152 = vmatmul.mubr.f32.gmra.mrb[4].mxu1 %v23_v59 }
  0x4d   :  { %136 = vmatprep.mubr.f32.mxu0 %v18_v60 }
  0x50   :  { %137 = vmatmul.mubr.f32.gmra.mrb[6].mxu0 %v17_v61 }
 0x117   :  { %v123_v62 = vpop.f32.mrb[0].mxu0  ;;  %v143_v63 = vpop.f32.mrb[0].mxu1 }
 0x118   :  { %161 = vst [vmem:[%s421_s2] sm:$0xff] %v123_v62  ;;  %v125_v0 = vpop.f32.mrb[1].mxu0  ;;  %165 = vst [vmem:[%s421_s2 + $0x20] sm:$0xff] %v143_v63  ;;  %v145_v1 = vpop.f32.mrb[1].mxu1 }
 0x11b   :  { %v128_v2 = vpop.f32.mrb[2].mxu0  ;;  %v148_v3 = vpop.f32.mrb[2].mxu1 }
 0x11c   :  { %162 = vst [vmem:[%s421_s2 + $0x8] sm:$0xff] %v128_v2  ;;  %v130_v4 = vpop.f32.mrb[3].mxu0  ;;  %166 = vst [vmem:[%s421_s2 + $0x28] sm:$0xff] %v148_v3  ;;  %v150_v5 = vpop.f32.mrb[3].mxu1 }
 0x11f   :  { %v133_v6 = vpop.f32.mrb[4].mxu0  ;;  %v153_v7 = vpop.f32.mrb[4].mxu1 }
 0x120   :  { %163 = vst [vmem:[%s421_s2 + $0x10] sm:$0xff] %v133_v6  ;;  %v135_v8 = vpop.f32.mrb[5].mxu0  ;;  %167 = vst [vmem:[%s421_s2 + $0x30] sm:$0x1] %v153_v7  ;;  %v155_v9 = vpop.f32.mrb[5].mxu1 }
 0x123   :  { %v138_v10 = vpop.f32.mrb[6].mxu0 }
 0x124   :  { %164 = vst [vmem:[%s421_s2 + $0x18] sm:$0xff] %v138_v10  ;;  %v140_v11 = vpop.f32.mrb[7].mxu0 }

</bundles_post_ra>
